<compile_context>
chip_gen: v7x
topology: tpu7x:2x2x1
jax: 0.10.0
libtpu: 0.0.40
codegen_flags: <defaults>
</compile_context>

<pallas_src>
import jax
import jax.numpy as jnp
from jax.experimental import pallas as pl
from jax.experimental.pallas import tpu as pltpu


def _copy_kernel(x_ref, o_ref):
    # Pure pass-through of the current VMEM tile (identity forward).
    o_ref[...] = x_ref[...]


_LANES = (1024, 512, 256, 128)        # lane-dense widths (multiples of 128)
_SMALL_BYTES = 4 * 1024 * 1024        # <= 4 MiB: single full-array block


def _chip_flags():
    """Return (is_v7x, target_tile_bytes, vmem_limit_bytes) for this device."""
    try:
        kind = jax.devices()[0].device_kind.lower()
    except Exception:
        kind = ""
    is_v7 = ("v7" in kind) or ("7x" in kind) or ("tpu7" in kind)
    if is_v7:
        # 64 MiB physical VMEM (32 MiB scoped): 4 MiB tiles keep the 4 live
        # double-buffered tiles at 16 MiB.
        return True, 4 * 1024 * 1024, 32 * 1024 * 1024
    # v5e / v6e: 128 MiB physical VMEM, single TensorCore -> biggest tiles win.
    return False, 8 * 1024 * 1024, 64 * 1024 * 1024


def _factor(total):
    """Widest lane width in _LANES that divides `total` exactly (no padding)."""
    for lane in _LANES:
        if total % lane == 0:
            return lane, total // lane
    return None, None


def tree_cnn_forward(x, *, donated=False):
    """Identity forward of TreeCNN via a Pallas TPU kernel (no pad/slice)."""
    orig_shape = x.shape
    total = int(x.size)
    if total == 0:
        return x
    itemsize = jnp.dtype(x.dtype).itemsize
    nbytes = total * itemsize
    is_v7, tile_bytes, vmem_limit = _chip_flags()
    packing = max(1, 4 // itemsize)       # elems per 32-bit sublane word
    sub = 8 * packing                     # sublane alignment (f32:8, bf16:16)

    lane, rows = _factor(total)

    # ---- Donated fast path: output aliases x's HBM buffer, which already
    # holds the data; only one (8,128) tile is rewritten (~8 KiB of traffic
    # when x is actually donated). Needs a clean lane-dense factorization.
    if donated and lane is not None and rows >= 8:
        x2d = x.reshape(rows, lane)
        out2d = pl.pallas_call(
            _copy_kernel,
            out_shape=jax.ShapeDtypeStruct((rows, lane), x.dtype),
            grid=(1,),
            in_specs=[pl.BlockSpec((8, 128), lambda i: (0, 0))],
            out_specs=pl.BlockSpec((8, 128), lambda i: (0, 0)),
            input_output_aliases={0: 0},
            compiler_params=pltpu.CompilerParams(vmem_limit_bytes=vmem_limit),
            cost_estimate=pl.CostEstimate(
                flops=0, transcendentals=0,
                bytes_accessed=2 * 8 * 128 * itemsize),
        )(x2d)
        return out2d.reshape(orig_shape)

    # ---- Small-input fast path: one full-array block (exempt from the
    # (8,128) divisibility rule), grid of 1, no padding, no per-step overhead.
    if nbytes <= _SMALL_BYTES:
        if lane is None:
            rows, lane = 1, total
        x2d = x.reshape(rows, lane)
        out2d = pl.pallas_call(
            _copy_kernel,
            out_shape=jax.ShapeDtypeStruct((rows, lane), x.dtype),
            grid=(1,),
            in_specs=[pl.BlockSpec((rows, lane), lambda i: (0, 0))],
            out_specs=pl.BlockSpec((rows, lane), lambda i: (0, 0)),
            compiler_params=pltpu.CompilerParams(vmem_limit_bytes=vmem_limit),
            cost_estimate=pl.CostEstimate(
                flops=0, transcendentals=0, bytes_accessed=2 * nbytes),
        )(x2d)
        return out2d.reshape(orig_shape)

    if lane is None:
        # No clean lane-dense factorization and too large for one block.
        # forward is the identity -> elide the copy (no pad/slice passes).
        return x

    # ---- Large-input tiled copy: lane-dense, double-buffered, no padding.
    # Ragged trailing tile is fine: OOB stores are masked and OOB reads are
    # don't-care for a pure copy.
    tile_rows = max(sub, (tile_bytes // (lane * itemsize)) // sub * sub)
    if tile_rows >= rows:
        tile_rows = rows                  # block == full dim -> exempt
        steps = 1
    else:
        steps = pl.cdiv(rows, tile_rows)
        if is_v7:
            # Even step count so both v7x TensorCores get equal work.
            steps = max(2, steps)
            if steps % 2:
                steps += 1
            tile_rows = max(sub, pl.cdiv(pl.cdiv(rows, steps), sub) * sub)
            steps = pl.cdiv(rows, tile_rows)

    x2d = x.reshape(rows, lane)
    out2d = pl.pallas_call(
        _copy_kernel,
        out_shape=jax.ShapeDtypeStruct((rows, lane), x.dtype),
        grid=(steps,),
        in_specs=[pl.BlockSpec((tile_rows, lane), lambda i: (i, 0))],
        out_specs=pl.BlockSpec((tile_rows, lane), lambda i: (i, 0)),
        compiler_params=pltpu.CompilerParams(
            dimension_semantics=("parallel",),
            vmem_limit_bytes=vmem_limit,
        ),
        cost_estimate=pl.CostEstimate(
            flops=0, transcendentals=0, bytes_accessed=2 * nbytes),
    )(x2d)
    return out2d.reshape(orig_shape)


if __name__ == "__main__":
    key = jax.random.PRNGKey(0)

    # Small NCHW input consistent with a CNN-style module (single-block path).
    x = jax.random.normal(key, (2, 4, 16, 16), dtype=jnp.float32)
    y = tree_cnn_forward(x)
    jax.block_until_ready(y)
    assert y.shape == x.shape and y.dtype == x.dtype
    assert bool(jnp.all(y == x))

    # Larger input to exercise the chip-gated tiled path (multi-step grid on
    # all generations) and the donated minimal-touch alias path.
    x_big = jax.random.normal(key, (2048, 2048), dtype=jnp.float32)  # 16 MiB
    y_big = tree_cnn_forward(x_big)
    jax.block_until_ready(y_big)
    assert bool(jnp.all(y_big == x_big))

    y_alias = tree_cnn_forward(x_big, donated=True)
    jax.block_until_ready(y_alias)
    assert bool(jnp.all(y_alias == x_big))

    print("KERNEL_OK")
</pallas_src>

<mosaic_0001>
module attributes {stable_mosaic.version = 11 : i64} {
  func.func @_copy_kernel(%arg0: i32, %arg1: memref<2x1024xf32, #tpu.memory_space<vmem>>, %arg2: memref<2x1024xf32, #tpu.memory_space<vmem>>) attributes {dimension_semantics = [#tpu.dimension_semantics<arbitrary>], iteration_bounds = array<i64: 1>, scalar_prefetch = 0 : i64, scratch_operands = 0 : i64, tpu.core_type = #tpu.core_type<tc>, window_params = [{pipeline_mode = #tpu.pipeline_mode<synchronous>, transform_indices = @transform_0, window_bounds = array<i64: 2, 1024>}, {pipeline_mode = #tpu.pipeline_mode<synchronous>, transform_indices = @transform_1, window_bounds = array<i64: 2, 1024>}]} {
    %c0 = arith.constant 0 : index
    %c0_0 = arith.constant 0 : index
    %0 = vector.load %arg1[%c0, %c0_0] : memref<2x1024xf32, #tpu.memory_space<vmem>>, vector<2x1024xf32>
    %c0_1 = arith.constant 0 : index
    %c0_2 = arith.constant 0 : index
    %1 = vector.load %arg2[%c0_1, %c0_2] : memref<2x1024xf32, #tpu.memory_space<vmem>>, vector<2x1024xf32>
    tpu.vector_store %arg2[%c0_1, %c0_2], %0 {strides = array<i32>} : memref<2x1024xf32, #tpu.memory_space<vmem>>, vector<2x1024xf32>,
    return
  }
  func.func @transform_0(%arg0: i32) -> (i32, i32) {
    %c0_i32 = arith.constant 0 : i32
    %c0_i32_0 = arith.constant 0 : i32
    %c0_i32_1 = arith.constant 0 : i32
    return %c0_i32, %c0_i32_0 : i32, i32
  }
  func.func @transform_1(%arg0: i32) -> (i32, i32) {
    %c0_i32 = arith.constant 0 : i32
    %c0_i32_0 = arith.constant 0 : i32
    %c0_i32_1 = arith.constant 0 : i32
    return %c0_i32, %c0_i32_0 : i32, i32
  }
}

</mosaic_0001>

<bundles_post_ra>
// kernel: tpu_custom_call.1
= control target key start
LH: loop header
LB: loop body
LE: loop exit
PB: predicated region body
PF: predicated region fallthrough
CT: control target
= control target key end

     0   :  { %6 = vsyncpa [#allocation3], 0  ;;  %s126_s0 = inlined_call_operand.hbm [shape: f32[2,1024], index: 0, kind: input, shape index: {}]   ;;  %s127_s1 = inlined_call_operand.hbm [shape: f32[2,1024], index: 1, kind: output, shape index: {}]  }
   0x1   :  { %7 = vsyncpa [#allocation4], 0  ;;  %s90_s6 = smov [#allocation2]   ;;  %s42_s10 = scalar_lea.hbm %s126_s0, 256 }
   0x2   :  { %s14_s7 = sshll.u32 %s90_s6, 4  ;;  %p43_p0 = scmp.ne.s32.totalorder %s126_s0, %s42_s10  ;;  %s15_s7 = int_to_ptr.vmem [resolvable:$true] %s14_s7 }
   0x3   :  { %p46_p1 = scmp.lt.u32.totalorder %s42_s10, %s126_s0 }
   0x5   :  { %p48_p2 = pnand %p46_p1, %p43_p0 }
   0x7   :  { %51 = shalt.err (!%p48_p2)
}
   0x8   :  { %s52_s15 = scalar_lea.vmem %s15_s7, 256  ;;  %p57_p4 = scmp.lt.s32.totalorder %s15_s7, %s15_s7 }
   0x9   :  { %p53_p3 = scmp.ne.s32.totalorder %s15_s7, %s52_s15  ;;  %p58_p5 = scmp.lt.s32.totalorder %s52_s15, %s52_s15 }
   0xb   :  { %p59_p6 = por %p58_p5, %p57_p4 }
   0xd   :  { %p60_p7 = pnand %p59_p6, %p53_p3 }
   0xf   :  { %63 = shalt.err (!%p60_p7)
}
  0x10   :  { %17 = dma.hbm_to_vmem [thread:$0]  %s126_s0, 256, %s15_s7, [#allocation3]  }
  0x11   :  { %86 = dma.done.wait [#allocation3], 256  }
  0x12   :  { %87 = vsyncadd [#allocation3], 4294967040  ;;  %s91_s18 = smov [#allocation5]   ;;  %v21_v0 = vld [vmem:[#allocation2] sm:$0xff]  ;;  %v22_v1 = vld [vmem:[#allocation2 + $0x8] sm:$0xff] }
  0x13   :  { %s31_s19 = sshll.u32 %s91_s18, 4  ;;  %23 = vst [vmem:[#allocation5] sm:$0xff] %v21_v0  ;;  %24 = vst [vmem:[#allocation5 + $0x8] sm:$0xff] %v22_v1  ;;  %s32_s19 = int_to_ptr.vmem [resolvable:$true] %s31_s19 }
  0x14   :  { %s64_s20 = scalar_lea.vmem %s32_s19, 256  ;;  %p69_p9 = scmp.lt.s32.totalorder %s32_s19, %s32_s19 }
  0x15   :  { %p65_p8 = scmp.ne.s32.totalorder %s32_s19, %s64_s20  ;;  %p70_p10 = scmp.lt.s32.totalorder %s64_s20, %s64_s20 }
  0x17   :  { %p71_p11 = por %p70_p10, %p69_p9 }
  0x19   :  { %p72_p12 = pnand %p71_p11, %p65_p8 }
  0x1b   :  { %75 = shalt.err (!%p72_p12)
}
  0x1c   :  { %s76_s0 = scalar_lea.hbm %s127_s1, 256 }
  0x1d   :  { %p77_p13 = scmp.ne.s32.totalorder %s127_s1, %s76_s0  ;;  %p80_p0 = scmp.lt.u32.totalorder %s76_s0, %s127_s1 }
  0x1f   :  { %p82_p1 = pnand %p80_p0, %p77_p13 }
  0x21   :  { %85 = shalt.err (!%p82_p1)
}
  0x22   :  { %34 = dma.vmem_to_hbm [thread:$0]  %s32_s19, 256, %s127_s1, [#allocation4]  }
  0x23   :  { %88 = dma.done.wait [#allocation4], 256  }
  0x24   :  { %89 = vsyncadd [#allocation4], 4294967040 }
  0x25   :  { %38 = vsyncpa [#allocation3], 1 }
  0x26   :  { %39 = vsyncpa [#allocation4], 1 }

</bundles_post_ra>
